<compile_context>
chip_gen: v7x
topology: tpu7x:2x2x1
jax: 0.10.0
libtpu: 0.0.40
codegen_flags: <defaults>
</compile_context>

<pallas_src>
import math

import jax
import jax.numpy as jnp
from jax.experimental import pallas as pl
from jax.experimental.pallas import tpu as pltpu


def _round_up(x, m):
    return ((x + m - 1) // m) * m


def _dqn_kernel(x_ref, w1_ref, b1_ref, w2_ref, b2_ref, o_ref):
    # x_ref:  (TB, num_state)          bf16   (streamed per grid step)
    # w1_ref: (num_state, num_hiddens) bf16   (resident)
    # b1_ref: (1, num_hiddens)         f32    (resident)
    # w2_ref: (num_hiddens, ACT_PAD)   bf16   (resident, zero-padded lanes)
    # b2_ref: (1, ACT_PAD)             f32    (resident, zero-padded lanes)
    # o_ref:  (TB, ACT_PAD)            f32    (lane-dense output slab)
    x = x_ref[...]
    h = jnp.dot(x, w1_ref[...], preferred_element_type=jnp.float32) + b1_ref[...]
    h = jnp.tanh(h)                                   # f32 on the EUP/VPU
    out = jnp.dot(h.astype(jnp.bfloat16), w2_ref[...],
                  preferred_element_type=jnp.float32) + b2_ref[...]
    o_ref[...] = out.astype(o_ref.dtype)


def prepare_dqn_params(params):
    """One-time conversion of torch-layout params into kernel-ready tensors.

    Hoists the transposes / reshapes / casts out of the per-call forward path
    and pads the output dimension to a lane-dense multiple of 128.
    """
    w1 = jnp.asarray(params["w1"], jnp.float32)   # (hid, num_state)
    b1 = jnp.asarray(params["b1"], jnp.float32)   # (hid,)
    w2 = jnp.asarray(params["w2"], jnp.float32)   # (num_action, hid)
    b2 = jnp.asarray(params["b2"], jnp.float32)   # (num_action,)

    num_hiddens, num_state = w1.shape
    num_action = w2.shape[0]
    act_pad = _round_up(num_action, 128)          # lane-dense output width

    w1_t = w1.T.astype(jnp.bfloat16)              # (num_state, hid)
    w2_t = jnp.zeros((num_hiddens, act_pad), jnp.float32)
    w2_t = w2_t.at[:, :num_action].set(w2.T).astype(jnp.bfloat16)
    b1_r = b1[None, :]                            # (1, hid), f32
    b2_r = jnp.zeros((1, act_pad), jnp.float32).at[0, :num_action].set(b2)

    return {
        "w1_t": w1_t, "b1_r": b1_r, "w2_t": w2_t, "b2_r": b2_r,
        "num_state": num_state, "num_hiddens": num_hiddens,
        "num_action": num_action, "act_pad": act_pad,
    }


def dqn_forward(state, prepared, tile_batch=None):
    """Pallas-backed DQN.forward.

    state    : float array, trailing dim == num_state (any leading dims)
    prepared : output of prepare_dqn_params (kernel-ready weights)
    """
    num_state = prepared["num_state"]
    num_hiddens = prepared["num_hiddens"]
    num_action = prepared["num_action"]
    act_pad = prepared["act_pad"]
    w1_t, b1_r = prepared["w1_t"], prepared["b1_r"]
    w2_t, b2_r = prepared["w2_t"], prepared["b2_r"]

    lead_shape = state.shape[:-1]
    x = state.reshape(-1, num_state).astype(jnp.bfloat16)
    B = x.shape[0]

    # Batch tile: multiple of 8 sublanes; cap at 512 rows (well inside the
    # v5e 16 MiB / v7x 32 MiB scoped-VMEM defaults even with double-buffering:
    # 2*x-tile(bf16) + 2*out-tile(f32, 128 lanes) + weights < 1 MiB).
    if tile_batch is None:
        tb = min(512, _round_up(max(B, 1), 8))
    else:
        tb = _round_up(tile_batch, 8)
    b_pad = _round_up(B, tb)
    if b_pad != B:
        x = jnp.pad(x, ((0, b_pad - B), (0, 0)))
    grid = (b_pad // tb,)

    cost = pl.CostEstimate(
        flops=2 * b_pad * (num_state * num_hiddens + num_hiddens * act_pad),
        transcendentals=b_pad * num_hiddens,
        bytes_accessed=(x.size * 2                      # bf16 x
                        + w1_t.size * 2 + w2_t.size * 2  # bf16 weights
                        + b1_r.size * 4 + b2_r.size * 4  # f32 biases
                        + b_pad * act_pad * 4),          # f32 output
    )

    out = pl.pallas_call(
        _dqn_kernel,
        out_shape=jax.ShapeDtypeStruct((b_pad, act_pad), jnp.float32),
        grid=grid,
        in_specs=[
            pl.BlockSpec((tb, num_state), lambda i: (i, 0)),        # x: streamed
            pl.BlockSpec((num_state, num_hiddens), lambda i: (0, 0)),  # w1: resident
            pl.BlockSpec((1, num_hiddens), lambda i: (0, 0)),          # b1: resident
            pl.BlockSpec((num_hiddens, act_pad), lambda i: (0, 0)),    # w2: resident
            pl.BlockSpec((1, act_pad), lambda i: (0, 0)),              # b2: resident
        ],
        out_specs=pl.BlockSpec((tb, act_pad), lambda i: (i, 0)),
        compiler_params=pltpu.CompilerParams(
            dimension_semantics=("parallel",),   # shard batch grid on v7x's 2 TCs
        ),
        cost_estimate=cost,
    )(x, w1_t, b1_r, w2_t, b2_r)

    # Slice off batch padding and the lane padding of the output slab.
    return out[:B, :num_action].reshape(lead_shape + (num_action,))


def init_dqn_params(key, num_state, num_action, num_hiddens):
    """Deterministic init mimicking torch.nn.Linear default (U[-1/sqrt(fan_in), +])."""
    k1, k2, k3, k4 = jax.random.split(key, 4)
    bound1 = 1.0 / math.sqrt(num_state)
    bound2 = 1.0 / math.sqrt(num_hiddens)
    return {
        "w1": jax.random.uniform(k1, (num_hiddens, num_state), jnp.float32,
                                 -bound1, bound1),
        "b1": jax.random.uniform(k2, (num_hiddens,), jnp.float32, -bound1, bound1),
        "w2": jax.random.uniform(k3, (num_action, num_hiddens), jnp.float32,
                                 -bound2, bound2),
        "b2": jax.random.uniform(k4, (num_action,), jnp.float32, -bound2, bound2),
    }


def _reference_forward(state, params):
    x = state.reshape(-1, params["w1"].shape[1]).astype(jnp.float32)
    h = jnp.tanh(x @ params["w1"].T + params["b1"])
    out = h @ params["w2"].T + params["b2"]
    return out.reshape(state.shape[:-1] + (params["w2"].shape[0],))


if __name__ == "__main__":
    num_state, num_action, num_hiddens = 8, 4, 32
    key = jax.random.PRNGKey(0)
    k_params, k_state1, k_state2 = jax.random.split(key, 3)

    params = init_dqn_params(k_params, num_state, num_action, num_hiddens)
    prepared = prepare_dqn_params(params)   # hoisted once, reused every forward

    # Check 1: small state with extra leading dims (single-tile grid).
    state = jax.random.normal(k_state1, (2, 4, num_state), jnp.float32)
    out = jax.block_until_ready(dqn_forward(state, prepared))
    ref = _reference_forward(state, params)
    assert out.shape == (2, 4, num_action), out.shape
    # bf16 MXU inputs with f32 accumulation -> relaxed tolerance vs f32 reference.
    assert jnp.allclose(out, ref, atol=5e-2, rtol=5e-2), "mismatch vs reference (1)"

    # Check 2: batch not divisible by the tile -> exercises multi-tile grid and
    # trailing-tile padding + wrapper slicing.
    state2 = jax.random.normal(k_state2, (5, 6, num_state), jnp.float32)  # B=30, tb=8
    out2 = jax.block_until_ready(dqn_forward(state2, prepared, tile_batch=8))
    ref2 = _reference_forward(state2, params)
    assert out2.shape == (5, 6, num_action), out2.shape
    assert jnp.allclose(out2, ref2, atol=5e-2, rtol=5e-2), "mismatch vs reference (2)"

    print("KERNEL_OK")
</pallas_src>

<mosaic_0001>
module attributes {stable_mosaic.version = 11 : i64} {
  func.func @_dqn_kernel(%arg0: i32, %arg1: memref<8x8xbf16, #tpu.memory_space<vmem>>, %arg2: memref<8x32xbf16, #tpu.memory_space<vmem>>, %arg3: memref<1x32xf32, #tpu.memory_space<vmem>>, %arg4: memref<32x128xbf16, #tpu.memory_space<vmem>>, %arg5: memref<1x128xf32, #tpu.memory_space<vmem>>, %arg6: memref<8x128xf32, #tpu.memory_space<vmem>>) attributes {dimension_semantics = [#tpu.dimension_semantics<parallel>], iteration_bounds = array<i64: 1>, scalar_prefetch = 0 : i64, scratch_operands = 0 : i64, tpu.core_type = #tpu.core_type<tc>, window_params = [{transform_indices = @transform_0, window_bounds = array<i64: 8, 8>}, {pipeline_mode = #tpu.pipeline_mode<synchronous>, transform_indices = @transform_1, window_bounds = array<i64: 8, 32>}, {pipeline_mode = #tpu.pipeline_mode<synchronous>, transform_indices = @transform_2, window_bounds = array<i64: 1, 32>}, {pipeline_mode = #tpu.pipeline_mode<synchronous>, transform_indices = @transform_3, window_bounds = array<i64: 32, 128>}, {pipeline_mode = #tpu.pipeline_mode<synchronous>, transform_indices = @transform_4, window_bounds = array<i64: 1, 128>}, {transform_indices = @transform_5, window_bounds = array<i64: 8, 128>}]} {
    %c0 = arith.constant 0 : index
    %c0_0 = arith.constant 0 : index
    %0 = vector.load %arg1[%c0, %c0_0] : memref<8x8xbf16, #tpu.memory_space<vmem>>, vector<8x8xbf16>
    %c0_1 = arith.constant 0 : index
    %c0_2 = arith.constant 0 : index
    %1 = vector.load %arg2[%c0_1, %c0_2] : memref<8x32xbf16, #tpu.memory_space<vmem>>, vector<8x32xbf16>
    %cst = arith.constant dense<0.000000e+00> : vector<8x32xf32>
    %2 = tpu.matmul %0, %1, %cst {dimension_numbers = #tpu.dot_dimension_numbers<[1], [0], [0], [1], [0, 0, 1, 1], [], []>} : vector<8x8xbf16>, vector<8x32xbf16>, vector<8x32xf32> -> vector<8x32xf32>
    %c0_3 = arith.constant 0 : index
    %c0_4 = arith.constant 0 : index
    %3 = vector.load %arg3[%c0_3, %c0_4] : memref<1x32xf32, #tpu.memory_space<vmem>>, vector<1x32xf32>
    %4 = vector.broadcast %3 : vector<1x32xf32> to vector<8x32xf32>
    %5 = arith.addf %2, %4 : vector<8x32xf32>
    %6 = math.tanh %5 : vector<8x32xf32>
    %7 = arith.truncf %6 : vector<8x32xf32> to vector<8x32xbf16>
    %c0_5 = arith.constant 0 : index
    %c0_6 = arith.constant 0 : index
    %8 = vector.load %arg4[%c0_5, %c0_6] : memref<32x128xbf16, #tpu.memory_space<vmem>>, vector<32x128xbf16>
    %cst_7 = arith.constant dense<0.000000e+00> : vector<8x128xf32>
    %9 = tpu.matmul %7, %8, %cst_7 {dimension_numbers = #tpu.dot_dimension_numbers<[1], [0], [0], [1], [0, 0, 1, 1], [], []>} : vector<8x32xbf16>, vector<32x128xbf16>, vector<8x128xf32> -> vector<8x128xf32>
    %c0_8 = arith.constant 0 : index
    %c0_9 = arith.constant 0 : index
    %10 = vector.load %arg5[%c0_8, %c0_9] : memref<1x128xf32, #tpu.memory_space<vmem>>, vector<1x128xf32>
    %11 = vector.broadcast %10 : vector<1x128xf32> to vector<8x128xf32>
    %12 = arith.addf %9, %11 : vector<8x128xf32>
    %c0_10 = arith.constant 0 : index
    %c0_11 = arith.constant 0 : index
    %13 = vector.load %arg6[%c0_10, %c0_11] : memref<8x128xf32, #tpu.memory_space<vmem>>, vector<8x128xf32>
    tpu.vector_store %arg6[%c0_10, %c0_11], %12 {strides = array<i32>} : memref<8x128xf32, #tpu.memory_space<vmem>>, vector<8x128xf32>,
    return
  }
  func.func @transform_0(%arg0: i32) -> (i32, i32) {
    %c0_i32 = arith.constant 0 : i32
    %c0_i32_0 = arith.constant 0 : i32
    return %arg0, %c0_i32 : i32, i32
  }
  func.func @transform_1(%arg0: i32) -> (i32, i32) {
    %c0_i32 = arith.constant 0 : i32
    %c0_i32_0 = arith.constant 0 : i32
    %c0_i32_1 = arith.constant 0 : i32
    return %c0_i32, %c0_i32_0 : i32, i32
  }
  func.func @transform_2(%arg0: i32) -> (i32, i32) {
    %c0_i32 = arith.constant 0 : i32
    %c0_i32_0 = arith.constant 0 : i32
    %c0_i32_1 = arith.constant 0 : i32
    return %c0_i32, %c0_i32_0 : i32, i32
  }
  func.func @transform_3(%arg0: i32) -> (i32, i32) {
    %c0_i32 = arith.constant 0 : i32
    %c0_i32_0 = arith.constant 0 : i32
    %c0_i32_1 = arith.constant 0 : i32
    return %c0_i32, %c0_i32_0 : i32, i32
  }
  func.func @transform_4(%arg0: i32) -> (i32, i32) {
    %c0_i32 = arith.constant 0 : i32
    %c0_i32_0 = arith.constant 0 : i32
    %c0_i32_1 = arith.constant 0 : i32
    return %c0_i32, %c0_i32_0 : i32, i32
  }
  func.func @transform_5(%arg0: i32) -> (i32, i32) {
    %c0_i32 = arith.constant 0 : i32
    %c0_i32_0 = arith.constant 0 : i32
    return %arg0, %c0_i32 : i32, i32
  }
}

</mosaic_0001>

<bundles_post_ra>
// kernel: tpu_custom_call.1
= control target key start
LH: loop header
LB: loop body
LE: loop exit
PB: predicated region body
PF: predicated region fallthrough
CT: control target
= control target key end

     0   :  { %10 = vsyncpa [#allocation3], 0  ;;  %s425_s0 = inlined_call_operand.hbm [shape: bf16[8,8], index: 0, kind: input, shape index: {}]   ;;  %s426_s1 = inlined_call_operand.hbm [shape: bf16[8,32], index: 1, kind: input, shape index: {}]   ;;  %s427_s2 = inlined_call_operand.vmem [shape: f32[1,32], index: 2, kind: input, shape index: {}]   ;;  %s428_s3 = inlined_call_operand.hbm [shape: bf16[32,128], index: 3, kind: input, shape index: {}]   ;;  %s429_s4 = inlined_call_operand.vmem [shape: f32[1,128], index: 4, kind: input, shape index: {}]   ;;  %s430_s5 = inlined_call_operand.hbm [shape: f32[8,128], index: 5, kind: output, shape index: {}]  }
   0x1   :  { %11 = vsyncpa [#allocation6], 0 }
   0x2   :  { %12 = vsyncpa [#allocation4], 0  ;;  %s333_s18 = smov [#allocation5]   ;;  %s334_s20 = smov [#allocation2]  }
   0x3   :  { %s29_s19 = sshll.u32 %s333_s18, 4  ;;  %s19_s21 = sshll.u32 %s334_s20, 4  ;;  %s30_s19 = int_to_ptr.vmem [resolvable:$true] %s29_s19  ;;  %s20_s21 = int_to_ptr.vmem [resolvable:$true] %s19_s21 }
   0x4   :  { %s239_s24 = scalar_lea.hbm %s426_s1, 64 }
   0x5   :  { %p240_p0 = scmp.ne.s32.totalorder %s426_s1, %s239_s24  ;;  %p243_p1 = scmp.lt.u32.totalorder %s239_s24, %s426_s1 }
   0x7   :  { %p245_p2 = pnand %p243_p1, %p240_p0 }
   0x9   :  { %248 = shalt.err (!%p245_p2)
}
   0xa   :  { %s249_s29 = scalar_lea.vmem %s30_s19, 64  ;;  %p254_p4 = scmp.lt.s32.totalorder %s30_s19, %s30_s19 }
   0xb   :  { %p250_p3 = scmp.ne.s32.totalorder %s30_s19, %s249_s29  ;;  %p255_p5 = scmp.lt.s32.totalorder %s249_s29, %s249_s29 }
   0xd   :  { %p256_p6 = por %p255_p5, %p254_p4 }
   0xf   :  { %p257_p7 = pnand %p256_p6, %p250_p3 }
  0x11   :  { %260 = shalt.err (!%p257_p7)
}
  0x12   :  { %32 = dma.hbm_to_vmem [thread:$0]  %s426_s1, 64, %s30_s19, [#allocation6]  }
  0x13   :  { %s261_s9 = scalar_lea.hbm %s425_s0, 64 }
  0x14   :  { %p262_p8 = scmp.ne.s32.totalorder %s425_s0, %s261_s9  ;;  %p265_p9 = scmp.lt.u32.totalorder %s261_s9, %s425_s0 }
  0x16   :  { %p267_p10 = pnand %p265_p9, %p262_p8 }
  0x18   :  { %270 = shalt.err (!%p267_p10)
}
  0x19   :  { %s271_s14 = scalar_lea.vmem %s20_s21, 64  ;;  %p276_p12 = scmp.lt.s32.totalorder %s20_s21, %s20_s21 }
  0x1a   :  { %p272_p11 = scmp.ne.s32.totalorder %s20_s21, %s271_s14  ;;  %p277_p13 = scmp.lt.s32.totalorder %s271_s14, %s271_s14 }
  0x1c   :  { %p278_p0 = por %p277_p13, %p276_p12 }
  0x1e   :  { %p279_p1 = pnand %p278_p0, %p272_p11 }
  0x20   :  { %282 = shalt.err (!%p279_p1)
}
  0x21   :  { %22 = dma.hbm_to_vmem [thread:$0]  %s425_s0, 64, %s20_s21, [#allocation3]  }
  0x22   :  { %s335_s16 = smov [#allocation7]   ;;  %s283_s20 = scalar_lea.hbm %s428_s3, 256 }
  0x23   :  { %s40_s17 = sshll.u32 %s335_s16, 4  ;;  %p284_p2 = scmp.ne.s32.totalorder %s428_s3, %s283_s20  ;;  %s41_s17 = int_to_ptr.vmem [resolvable:$true] %s40_s17 }
  0x24   :  { %p287_p3 = scmp.lt.u32.totalorder %s283_s20, %s428_s3 }
  0x26   :  { %p289_p4 = pnand %p287_p3, %p284_p2 }
  0x28   :  { %292 = shalt.err (!%p289_p4)
}
  0x29   :  { %s293_s26 = scalar_lea.vmem %s41_s17, 256  ;;  %p298_p6 = scmp.lt.s32.totalorder %s41_s17, %s41_s17 }
  0x2a   :  { %p294_p5 = scmp.ne.s32.totalorder %s41_s17, %s293_s26  ;;  %p299_p7 = scmp.lt.s32.totalorder %s293_s26, %s293_s26 }
  0x2c   :  { %p300_p8 = por %p299_p7, %p298_p6 }
  0x2e   :  { %p301_p9 = pnand %p300_p8, %p294_p5 }
  0x30   :  { %304 = shalt.err (!%p301_p9)
}
  0x31   :  { %s336_s0 = smov 64   ;;  %s337_s21 = smov 4  }
  0x32   :  { %46 = dma.hbm_to_vmem [thread:$0]  %s428_s3, 256, %s41_s17, [#allocation6], %s336_s0, %s336_s0, %s337_s21  }
  0x33   :  { %327 = dma.done.wait [#allocation3], 64  }
  0x34   :  { %328 = vsyncadd [#allocation3], 4294967232 }
  0x35   :  { %329 = dma.done.wait [#allocation6], 320  }
  0x36   :  { %330 = vsyncadd [#allocation6], 4294966976  ;;  %v338_v0 = vmov 0.0   ;;  %vm339_vm0 = vmmov 0   ;;  %vm72_vm1 = vcmask 1043456   ;;  %vm68_vm2 = vcmask 64512  }
  0x37   :  { %213 = vmatprep.subr.bf16.mxu0 %v338_v0  ;;  %215 = vmatprep.mubr.msk.bf16.mxu0 %vm339_vm0, %v338_v0  ;;  %v60_v1 = vld [vmem:[#allocation5] sm:$0xf]  ;;  %v59_v3 = vld [vmem:[#allocation2] sm:$0xf]  ;;  %v235_v4 = vld [vmem:[#allocation7] sm:$0xff]   ;;  %vm141_vm3 = vcmask 261120  }
  0x38   :  { %219 = vmatprep.subr.bf16.mxu1 %v338_v0  ;;  %223 = vmatprep.mubr.msk.bf16.mxu1 %vm339_vm0, %v338_v0  ;;  %v74_v2 = vsel %vm72_vm1, %v60_v1, 0  ;;  %v236_v5 = vld [vmem:[#allocation7 + $0x8] sm:$0xff]   ;;  %v202_v6 = vld [vmem:[%s427_s2] ss:$0 sm:$0xff]  ;;  %s340_s7 = smov [#allocation8]  }
  0x39   :  { %214 = vmatpush3.bf16.msra.mxu0 %v74_v2  ;;  %220 = vmatpush3.bf16.msra.mxu1 %v235_v4  ;;  %v204_v14 = vld [vmem:[%s429_s4] ss:$0 sm:$0xff]  ;;  %s192_s8 = sshll.u32 %s340_s7, 4  ;;  %s193_s8 = int_to_ptr.vmem [resolvable:$true] %s192_s8 }
  0x3a   :  { %221 = vmatprep.subr.bf16.mxu1 %v338_v0  ;;  %s305_s2 = scalar_lea.vmem %s193_s8, 128  ;;  %p310_p11 = scmp.lt.s32.totalorder %s193_s8, %s193_s8 }
  0x3b   :  { %p306_p10 = scmp.ne.s32.totalorder %s193_s8, %s305_s2  ;;  %p311_p12 = scmp.lt.s32.totalorder %s305_s2, %s305_s2 }
  0x3c   :  { %216 = vmatmul.mubr.msk.bf16.vlgmr.msra.gmra.mrb[0].mxu0 %vm68_vm2, %v59_v3 }
  0x3d   :  { %222 = vmatpush3.bf16.msra.mxu1 %v236_v5  ;;  %p312_p13 = por %p311_p12, %p310_p11 }
  0x3f   :  { %p313_p0 = pnand %p312_p13, %p306_p10 }
 0x10f   :  { %v110_v7 = vpop.f32.mrb[0].mxu0 }
 0x110   :  { %v111_v8 = vadd.f32 %v202_v6, %v110_v7  ;;  %v217_v9 = vpop.f32.mrb[1].mxu0 }
 0x111   :  { %v113_v10 = vpop.f32.mrb[2].mxu0 }
 0x112   :  { %237 = vtanh.f32 %v111_v8  ;;  %v218_v11 = vpop.f32.mrb[3].mxu0 }
 0x11c   :  { %v238_v12 = vpop.eup %237 }
 0x11d   :  { %v117_v13 = vpack.c.bf16 %v238_v12, %v238_v12 }
 0x11f   :  { %224 = vmatmul.mubr.msk.bf16.vlgmr.msra.gmra.mrb[0].mxu1 %vm141_vm3, %v117_v13 }
 0x1f2   :  { %v179_v15 = vpop.f32.mrb[0].mxu1 }
 0x1f3   :  { %v180_v16 = vadd.f32 %v204_v14, %v179_v15  ;;  %v225_v17 = vpop.f32.mrb[1].mxu1 }
 0x1f4   :  { %v182_v18 = vpop.f32.mrb[2].mxu1 }
 0x1f5   :  { %185 = vst [vmem:[#allocation8] sm:$0xff] %v180_v16  ;;  %v226_v19 = vpop.f32.mrb[3].mxu1 }
 0x1f6   :  { %316 = shalt.err (!%p313_p0)
}
 0x1f7   :  { %s317_s4 = scalar_lea.hbm %s430_s5, 128 }
 0x1f8   :  { %p318_p1 = scmp.ne.s32.totalorder %s430_s5, %s317_s4  ;;  %p321_p2 = scmp.lt.u32.totalorder %s317_s4, %s430_s5 }
 0x1fa   :  { %p323_p3 = pnand %p321_p2, %p318_p1 }
 0x1fc   :  { %326 = shalt.err (!%p323_p3)
}
 0x1fd   :  { %195 = dma.vmem_to_hbm [thread:$0]  %s193_s8, 128, %s430_s5, [#allocation4]  }
 0x1fe   :  { %331 = dma.done.wait [#allocation4], 128  }
 0x1ff   :  { %332 = vsyncadd [#allocation4], 4294967168 }
 0x200   :  { %199 = vsyncpa [#allocation3], 1 }
 0x201   :  { %200 = vsyncpa [#allocation6], 1 }
 0x202   :  { %201 = vsyncpa [#allocation4], 1 }

</bundles_post_ra>
